<compile_context>
chip_gen: v7x
topology: tpu7x:2x2x1
jax: 0.10.0
libtpu: 0.0.40
codegen_flags: <defaults>
</compile_context>

<pallas_src>
import jax
import jax.numpy as jnp
from jax.experimental import pallas as pl
from jax.experimental.pallas import tpu as pltpu


def _fused_three_head_kernel(
    x_ref,     # (B, D)            float32
    w1_ref,    # (D, 3*2H)         float32  (heads concatenated along output lanes)
    b1_ref,    # (1, 3*2H)         float32
    w2_ref,    # (3*2H, 3*2H)      float32  (block-diagonal)
    b2_ref,    # (1, 3*2H)         float32
    w3_ref,    # (3*2H, 3)         float32  (block-diagonal columns)
    b3_ref,    # (1, 3)            float32
    out_ref,   # (B, 3)            float32
):
    x = x_ref[...]

    # Layer 1 (all 3 heads in one MXU matmul) + bias + ReLU
    h1 = jnp.dot(x, w1_ref[...], preferred_element_type=jnp.float32)
    h1 = jnp.maximum(h1 + b1_ref[...], 0.0)
    # Dropout(p=0.01) -> identity at inference.

    # Layer 2 (block-diagonal fused matmul) + bias + ReLU
    h2 = jnp.dot(h1, w2_ref[...], preferred_element_type=jnp.float32)
    h2 = jnp.maximum(h2 + b2_ref[...], 0.0)
    # Dropout -> identity.

    # Layer 3: one matmul produces the (B, 3) concatenated head outputs directly.
    out_ref[...] = jnp.dot(h2, w3_ref[...], preferred_element_type=jnp.float32) + b3_ref[...]


def three_head_mlp(x, fused):
    """x: (B, D) float32; fused: dict of pre-fused (lane-dense) parameters."""
    B = x.shape[0]
    vmem = pl.BlockSpec(memory_space=pltpu.MemorySpace.VMEM)
    return pl.pallas_call(
        _fused_three_head_kernel,
        out_shape=jax.ShapeDtypeStruct((B, 3), jnp.float32),
        in_specs=[vmem] * 7,
        out_specs=vmem,
        # Single grid-less invocation: whole problem fits comfortably in VMEM on
        # v5e/v6e/v7x; per-grid-step overhead would dominate at this size.
    )(
        x,
        fused["w1_all"], fused["b1_all"],
        fused["w2_blk"], fused["b2_all"],
        fused["w3_blk"], fused["b3_all"],
    )


def init_params(key, input_size, hidden_size):
    """Deterministic init mimicking PyTorch's default U(-1/sqrt(fan_in), +1/sqrt(fan_in)).

    Weights are stored per-head, already transposed to (in, out)."""
    H2 = hidden_size * 2
    ks = jax.random.split(key, 6)

    def u(k, shape, fan_in):
        bound = 1.0 / jnp.sqrt(fan_in)
        return jax.random.uniform(k, shape, jnp.float32, -bound, bound)

    return {
        "w1": u(ks[0], (3, input_size, H2), input_size),
        "b1": u(ks[1], (3, H2), input_size),
        "w2": u(ks[2], (3, H2, H2), H2),
        "b2": u(ks[3], (3, H2), H2),
        "w3": u(ks[4], (3, H2), H2),          # Linear(2H, 1) weight, squeezed
        "b3": u(ks[5], (1, 3), H2),           # Linear(2H, 1) bias, one per head
    }


def fuse_params(p):
    """Host-side weight re-layout (done once, outside the kernel).

    - Layer 1: concat head weights along the output (lane) dim -> (D, 3*2H)
    - Layer 2: block-diagonal (3*2H, 3*2H)
    - Layer 3: block-diagonal columns (3*2H, 3)
    - Biases concatenated into lane-dense rows.
    """
    D = p["w1"].shape[1]
    H2 = p["w1"].shape[2]

    w1_all = jnp.transpose(p["w1"], (1, 0, 2)).reshape(D, 3 * H2)
    b1_all = p["b1"].reshape(1, 3 * H2)

    w2_blk = jax.scipy.linalg.block_diag(p["w2"][0], p["w2"][1], p["w2"][2])
    b2_all = p["b2"].reshape(1, 3 * H2)

    w3_blk = jax.scipy.linalg.block_diag(
        p["w3"][0][:, None], p["w3"][1][:, None], p["w3"][2][:, None]
    )  # (3*2H, 3)
    b3_all = p["b3"]  # (1, 3)

    return {
        "w1_all": w1_all, "b1_all": b1_all,
        "w2_blk": w2_blk, "b2_all": b2_all,
        "w3_blk": w3_blk, "b3_all": b3_all,
    }


def reference(x, p):
    """Pure-JAX per-head reference for correctness check (matches PyTorch forward)."""
    outs = []
    for h in range(3):
        h1 = jnp.maximum(x @ p["w1"][h] + p["b1"][h], 0.0)
        h2 = jnp.maximum(h1 @ p["w2"][h] + p["b2"][h], 0.0)
        outs.append(jnp.sum(h2 * p["w3"][h], axis=-1, keepdims=True) + p["b3"][0, h])
    return jnp.concatenate(outs, axis=1)


if __name__ == "__main__":
    B, input_size, hidden_size = 8, 32, 32   # -> 2H = 64, fused width 3*2H = 192

    key = jax.random.PRNGKey(0)
    kx, kp = jax.random.split(key)
    x = jax.random.normal(kx, (B, input_size), jnp.float32)

    params = init_params(kp, input_size, hidden_size)
    fused = fuse_params(params)

    out = three_head_mlp(x, fused)
    out = jax.block_until_ready(out)

    ref = reference(x, params)
    assert out.shape == (B, 3), out.shape
    assert jnp.allclose(out, ref, atol=1e-5, rtol=1e-5), (out, ref)

    print("KERNEL_OK")
</pallas_src>

<mosaic_0001>
module attributes {stable_mosaic.version = 11 : i64} {
  func.func @_fused_three_head_kernel(%arg0: memref<8x32xf32, #tpu.memory_space<vmem>>, %arg1: memref<32x192xf32, #tpu.memory_space<vmem>>, %arg2: memref<1x192xf32, #tpu.memory_space<vmem>>, %arg3: memref<192x192xf32, #tpu.memory_space<vmem>>, %arg4: memref<1x192xf32, #tpu.memory_space<vmem>>, %arg5: memref<192x3xf32, #tpu.memory_space<vmem>>, %arg6: memref<1x3xf32, #tpu.memory_space<vmem>>, %arg7: memref<8x3xf32, #tpu.memory_space<vmem>>) attributes {dimension_semantics = [], scalar_prefetch = 0 : i64, scratch_operands = 0 : i64, tpu.core_type = #tpu.core_type<tc>} {
    %c0 = arith.constant 0 : index
    %c0_0 = arith.constant 0 : index
    %0 = vector.load %arg0[%c0, %c0_0] : memref<8x32xf32, #tpu.memory_space<vmem>>, vector<8x32xf32>
    %c0_1 = arith.constant 0 : index
    %c0_2 = arith.constant 0 : index
    %1 = vector.load %arg1[%c0_1, %c0_2] : memref<32x192xf32, #tpu.memory_space<vmem>>, vector<32x192xf32>
    %cst = arith.constant dense<0.000000e+00> : vector<8x192xf32>
    %2 = tpu.matmul %0, %1, %cst {dimension_numbers = #tpu.dot_dimension_numbers<[1], [0], [0], [1], [0, 0, 1, 1], [], []>} : vector<8x32xf32>, vector<32x192xf32>, vector<8x192xf32> -> vector<8x192xf32>
    %c0_3 = arith.constant 0 : index
    %c0_4 = arith.constant 0 : index
    %3 = vector.load %arg2[%c0_3, %c0_4] : memref<1x192xf32, #tpu.memory_space<vmem>>, vector<1x192xf32>
    %4 = vector.broadcast %3 : vector<1x192xf32> to vector<8x192xf32>
    %5 = arith.addf %2, %4 : vector<8x192xf32>
    %cst_5 = arith.constant 0.000000e+00 : f32
    %6 = vector.broadcast %cst_5 : f32 to vector<8x192xf32>
    %7 = arith.maximumf %5, %6 : vector<8x192xf32>
    %c0_6 = arith.constant 0 : index
    %c0_7 = arith.constant 0 : index
    %8 = vector.load %arg3[%c0_6, %c0_7] : memref<192x192xf32, #tpu.memory_space<vmem>>, vector<192x192xf32>
    %cst_8 = arith.constant dense<0.000000e+00> : vector<8x192xf32>
    %9 = tpu.matmul %7, %8, %cst_8 {dimension_numbers = #tpu.dot_dimension_numbers<[1], [0], [0], [1], [0, 0, 1, 1], [], []>} : vector<8x192xf32>, vector<192x192xf32>, vector<8x192xf32> -> vector<8x192xf32>
    %c0_9 = arith.constant 0 : index
    %c0_10 = arith.constant 0 : index
    %10 = vector.load %arg4[%c0_9, %c0_10] : memref<1x192xf32, #tpu.memory_space<vmem>>, vector<1x192xf32>
    %11 = vector.broadcast %10 : vector<1x192xf32> to vector<8x192xf32>
    %12 = arith.addf %9, %11 : vector<8x192xf32>
    %cst_11 = arith.constant 0.000000e+00 : f32
    %13 = vector.broadcast %cst_11 : f32 to vector<8x192xf32>
    %14 = arith.maximumf %12, %13 : vector<8x192xf32>
    %c0_12 = arith.constant 0 : index
    %c0_13 = arith.constant 0 : index
    %15 = vector.load %arg5[%c0_12, %c0_13] : memref<192x3xf32, #tpu.memory_space<vmem>>, vector<192x3xf32>
    %cst_14 = arith.constant dense<0.000000e+00> : vector<8x3xf32>
    %16 = tpu.matmul %14, %15, %cst_14 {dimension_numbers = #tpu.dot_dimension_numbers<[1], [0], [0], [1], [0, 0, 1, 1], [], []>} : vector<8x192xf32>, vector<192x3xf32>, vector<8x3xf32> -> vector<8x3xf32>
    %c0_15 = arith.constant 0 : index
    %c0_16 = arith.constant 0 : index
    %17 = vector.load %arg6[%c0_15, %c0_16] : memref<1x3xf32, #tpu.memory_space<vmem>>, vector<1x3xf32>
    %18 = vector.broadcast %17 : vector<1x3xf32> to vector<8x3xf32>
    %19 = arith.addf %16, %18 : vector<8x3xf32>
    %c0_17 = arith.constant 0 : index
    %c0_18 = arith.constant 0 : index
    %20 = vector.load %arg7[%c0_17, %c0_18] : memref<8x3xf32, #tpu.memory_space<vmem>>, vector<8x3xf32>
    tpu.vector_store %arg7[%c0_17, %c0_18], %19 {strides = array<i32>} : memref<8x3xf32, #tpu.memory_space<vmem>>, vector<8x3xf32>,
    return
  }
}

</mosaic_0001>

<bundles_post_ra>
// kernel: tpu_custom_call.1
= control target key start
LH: loop header
LB: loop body
LE: loop exit
PB: predicated region body
PF: predicated region fallthrough
CT: control target
= control target key end

     0   :  { %12 = vsyncpa [#allocation3], 0  ;;  %s511_s24 = smov [#allocation2]   ;;  %s693_s0 = inlined_call_operand.vmem [shape: f32[8,32], index: 0, kind: input, shape index: {}]   ;;  %s694_s1 = inlined_call_operand.vmem [shape: f32[32,192], index: 1, kind: input, shape index: {}]   ;;  %s695_s2 = inlined_call_operand.vmem [shape: f32[1,192], index: 2, kind: input, shape index: {}]   ;;  %s696_s3 = inlined_call_operand.hbm [shape: f32[192,192], index: 3, kind: input, shape index: {}]   ;;  %s697_s4 = inlined_call_operand.vmem [shape: f32[1,192], index: 4, kind: input, shape index: {}]   ;;  %s698_s5 = inlined_call_operand.vmem [shape: f32[192,3], index: 5, kind: input, shape index: {}]   ;;  %s699_s6 = inlined_call_operand.vmem [shape: f32[1,3], index: 6, kind: input, shape index: {}]   ;;  %s700_s7 = inlined_call_operand.vmem [shape: f32[8,3], index: 7, kind: output, shape index: {}]  }
   0x1   :  { %s24_s25 = sshll.u32 %s511_s24, 4  ;;  %s487_s28 = scalar_lea.hbm %s696_s3, 6144  ;;  %s25_s25 = int_to_ptr.vmem [resolvable:$true] %s24_s25 }
   0x2   :  { %p488_p0 = scmp.ne.s32.totalorder %s696_s3, %s487_s28  ;;  %p491_p1 = scmp.lt.u32.totalorder %s487_s28, %s696_s3 }
   0x4   :  { %p493_p2 = pnand %p491_p1, %p488_p0 }
   0x6   :  { %496 = shalt.err (!%p493_p2)
}
   0x7   :  { %s497_s10 = scalar_lea.vmem %s25_s25, 6144  ;;  %p502_p4 = scmp.lt.s32.totalorder %s25_s25, %s25_s25 }
   0x8   :  { %p498_p3 = scmp.ne.s32.totalorder %s25_s25, %s497_s10  ;;  %p503_p5 = scmp.lt.s32.totalorder %s497_s10, %s497_s10 }
   0xa   :  { %p504_p6 = por %p503_p5, %p502_p4 }
   0xc   :  { %p505_p7 = pnand %p504_p6, %p498_p3 }
   0xe   :  { %508 = shalt.err (!%p505_p7)
}
   0xf   :  { %s512_s11 = smov 256   ;;  %s513_s12 = smov 16  }
  0x10   :  { %30 = dma.hbm_to_vmem [thread:$0]  %s696_s3, 6144, %s25_s25, [#allocation3], %s512_s11, %s512_s11, %s513_s12  }
  0x11   :  { %509 = dma.done.wait [#allocation3], 6144  }
  0x12   :  { %510 = vsyncadd [#allocation3], 4294961152  ;;  %v514_v0 = vmov 0.0   ;;  %v42_v1 = vld [vmem:[%s694_s1 + $0x8] sm:$0xff]  ;;  %v44_v2 = vld [vmem:[%s694_s1 + $0x18] sm:$0xff]  ;;  %vm61_vm0 = vcmask 261120  }
  0x13   :  { %129 = vmatprep.mubr.f32.mxu0 %v514_v0  ;;  %v41_v3 = vld [vmem:[%s694_s1] sm:$0xff]  ;;  %v390_v4 = vpack.c.bf16 %v44_v2, %v42_v1  ;;  %v43_v5 = vld [vmem:[%s694_s1 + $0x10] sm:$0xff]  ;;  %v46_v6 = vld [vmem:[%s694_s1 + $0x28] sm:$0xff]  ;;  %vm198_vm1 = vcmask 523264   ;;  %vm379_vm2 = vcmask 23552  }
  0x14   :  { %v48_v7 = vld [vmem:[%s694_s1 + $0x38] sm:$0xff]  ;;  %v392_v8 = vpack.c.bf16 %v43_v5, %v41_v3  ;;  %v45_v10 = vld [vmem:[%s694_s1 + $0x20] sm:$0xff]  ;;  %v47_v11 = vld [vmem:[%s694_s1 + $0x30] sm:$0xff] }
  0x15   :  { %v394_v9 = vpack.c.bf16 %v48_v7, %v46_v6  ;;  %391 = vmatprep.subr.bf16.mxu0 %v390_v4  ;;  %v139_v12 = vld [vmem:[#allocation2 + $0x8] sm:$0xff]  ;;  %v141_v13 = vld [vmem:[#allocation2 + $0x18] sm:$0xff]  ;;  %v138_v14 = vld [vmem:[#allocation2] sm:$0xff]  ;;  %v396_v15 = vpack.c.bf16 %v47_v11, %v45_v10 }
  0x16   :  { %393 = vmatpush1.bf16.msra.mxu0 %v392_v8  ;;  %v398_v16 = vpack.c.bf16 %v141_v13, %v139_v12  ;;  %v140_v17 = vld [vmem:[#allocation2 + $0x10] sm:$0xff]  ;;  %v143_v18 = vld [vmem:[#allocation2 + $0x28] sm:$0xff]  ;;  %v145_v19 = vld [vmem:[#allocation2 + $0x38] sm:$0xff] }
  0x17   :  { %395 = vmatprep.subr.bf16.mxu0 %v394_v9  ;;  %v400_v20 = vpack.c.bf16 %v140_v17, %v138_v14  ;;  %v402_v21 = vpack.c.bf16 %v145_v19, %v143_v18  ;;  %v142_v22 = vld [vmem:[#allocation2 + $0x20] sm:$0xff]  ;;  %v144_v23 = vld [vmem:[#allocation2 + $0x30] sm:$0xff]  ;;  %v147_v24 = vld [vmem:[#allocation2 + $0x48] sm:$0xff] }
  0x18   :  { %399 = vmatprep.subr.bf16.mxu1 %v398_v16  ;;  %v149_v25 = vld [vmem:[#allocation2 + $0x58] sm:$0xff]  ;;  %v404_v26 = vpack.c.bf16 %v144_v23, %v142_v22  ;;  %v40_v27 = vld [vmem:[%s693_s0] sm:$0xff]  ;;  %v148_v30 = vld [vmem:[#allocation2 + $0x50] sm:$0xff] }
  0x19   :  { %401 = vmatpush1.bf16.msra.mxu1 %v400_v20  ;;  %v406_v28 = vpack.c.bf16 %v149_v25, %v147_v24  ;;  %v146_v29 = vld [vmem:[#allocation2 + $0x40] sm:$0xff]  ;;  %v151_v31 = vld [vmem:[#allocation2 + $0x68] sm:$0xff]  ;;  %v153_v32 = vld [vmem:[#allocation2 + $0x78] sm:$0xff]  ;;  %v515_v25 = vmov 0.0|0.0  }
  0x1a   :  { %397 = vmatpush1.bf16.msra.mxu0 %v396_v15  ;;  %403 = vmatprep.subr.bf16.mxu1 %v402_v21  ;;  %v408_v33 = vpack.c.bf16 %v148_v30, %v146_v29  ;;  %v410_v34 = vpack.c.bf16 %v153_v32, %v151_v31  ;;  %v150_v35 = vld [vmem:[#allocation2 + $0x60] sm:$0xff]  ;;  %v152_v36 = vld [vmem:[#allocation2 + $0x70] sm:$0xff]  ;;  %v155_v37 = vld [vmem:[#allocation2 + $0x88] sm:$0xff] }
  0x1b   :  { %v157_v38 = vld [vmem:[#allocation2 + $0x98] sm:$0xff]  ;;  %v412_v39 = vpack.c.bf16 %v152_v36, %v150_v35  ;;  %v154_v41 = vld [vmem:[#allocation2 + $0x80] sm:$0xff]  ;;  %v156_v42 = vld [vmem:[#allocation2 + $0x90] sm:$0xff]  ;;  %446 = vmatprep.subr.bf16.mxu0 %v515_v25 }
  0x1c   :  { %v414_v40 = vpack.c.bf16 %v157_v38, %v155_v37  ;;  %v159_v43 = vld [vmem:[#allocation2 + $0xa8] sm:$0xff]  ;;  %v161_v44 = vld [vmem:[#allocation2 + $0xb8] sm:$0xff]  ;;  %v416_v45 = vpack.c.bf16 %v156_v42, %v154_v41  ;;  %v158_v47 = vld [vmem:[#allocation2 + $0xa0] sm:$0xff] }
  0x1d   :  { %386 = vmatmul.mubr.msk.f32.vlgmr.msra.gmra.mrb[0].mxu0 %vm61_vm0, %v40_v27  ;;  %405 = vmatpush1.bf16.msra.mxu1 %v404_v26  ;;  %v418_v46 = vpack.c.bf16 %v161_v44, %v159_v43  ;;  %v160_v48 = vld [vmem:[#allocation2 + $0xb0] sm:$0xff]  ;;  %v163_v49 = vld [vmem:[#allocation2 + $0xc8] sm:$0xff]  ;;  %v165_v50 = vld [vmem:[#allocation2 + $0xd8] sm:$0xff] }
  0x1e   :  { %407 = vmatprep.subr.bf16.mxu1 %v406_v28  ;;  %v420_v51 = vpack.c.bf16 %v160_v48, %v158_v47  ;;  %v422_v52 = vpack.c.bf16 %v165_v50, %v163_v49  ;;  %v162_v53 = vld [vmem:[#allocation2 + $0xc0] sm:$0xff]  ;;  %v164_v54 = vld [vmem:[#allocation2 + $0xd0] sm:$0xff]  ;;  %v167_v55 = vld [vmem:[#allocation2 + $0xe8] sm:$0xff] }
  0x1f   :  { %v169_v56 = vld [vmem:[#allocation2 + $0xf8] sm:$0xff]  ;;  %v424_v57 = vpack.c.bf16 %v164_v54, %v162_v53  ;;  %v166_v59 = vld [vmem:[#allocation2 + $0xe0] sm:$0xff]  ;;  %v168_v60 = vld [vmem:[#allocation2 + $0xf0] sm:$0xff]  ;;  %v51_v53 = vlaneseq }
  0x20   :  { %v426_v58 = vpack.c.bf16 %v169_v56, %v167_v55  ;;  %v171_v61 = vld [vmem:[#allocation2 + $0x108] sm:$0xff]  ;;  %v173_v62 = vld [vmem:[#allocation2 + $0x118] sm:$0xff]  ;;  %v428_v63 = vpack.c.bf16 %v168_v60, %v166_v59  ;;  %v170_v1 = vld [vmem:[#allocation2 + $0x100] sm:$0xff] }
  0x21   :  { %409 = vmatpush1.bf16.msra.mxu1 %v408_v33  ;;  %v430_v0 = vpack.c.bf16 %v173_v62, %v171_v61  ;;  %v172_v2 = vld [vmem:[#allocation2 + $0x110] sm:$0xff]  ;;  %v175_v3 = vld [vmem:[#allocation2 + $0x128] sm:$0xff]  ;;  %v177_v4 = vld [vmem:[#allocation2 + $0x138] sm:$0xff]  ;;  %v52_v54 = vshrl.u32 %v51_v53, 7 }
  0x22   :  { %411 = vmatprep.subr.bf16.mxu1 %v410_v34  ;;  %v432_v5 = vpack.c.bf16 %v172_v2, %v170_v1  ;;  %v434_v6 = vpack.c.bf16 %v177_v4, %v175_v3  ;;  %v174_v7 = vld [vmem:[#allocation2 + $0x120] sm:$0xff]  ;;  %v176_v8 = vld [vmem:[#allocation2 + $0x130] sm:$0xff]  ;;  %v179_v9 = vld [vmem:[#allocation2 + $0x148] sm:$0xff] }
  0x23   :  { %v181_v10 = vld [vmem:[#allocation2 + $0x158] sm:$0xff]  ;;  %v436_v11 = vpack.c.bf16 %v176_v8, %v174_v7  ;;  %v178_v13 = vld [vmem:[#allocation2 + $0x140] sm:$0xff]  ;;  %v180_v14 = vld [vmem:[#allocation2 + $0x150] sm:$0xff]  ;;  %v53_v55 = vsub.s32 0, %v52_v54 }
  0x24   :  { %v438_v12 = vpack.c.bf16 %v181_v10, %v179_v9  ;;  %v440_v15 = vpack.c.bf16 %v180_v14, %v178_v13  ;;  %v183_v16 = vld [vmem:[#allocation2 + $0x168] sm:$0xff]  ;;  %v185_v17 = vld [vmem:[#allocation2 + $0x178] sm:$0xff]  ;;  %v182_v19 = vld [vmem:[#allocation2 + $0x160] sm:$0xff] }
  0x25   :  { %413 = vmatpush1.bf16.msra.mxu1 %v412_v39  ;;  %v442_v18 = vpack.c.bf16 %v185_v17, %v183_v16  ;;  %v184_v20 = vld [vmem:[#allocation2 + $0x170] sm:$0xff]  ;;  %v275_v22 = vld [vmem:[%s698_s5] sm:$0xff]  ;;  %v276_v23 = vld [vmem:[%s698_s5 + $0x8] sm:$0xff] }
  0x26   :  { %415 = vmatprep.subr.bf16.mxu1 %v414_v40  ;;  %v444_v21 = vpack.c.bf16 %v184_v20, %v182_v19  ;;  %v277_v24 = vld [vmem:[%s698_s5 + $0x10] sm:$0xff]  ;;  %v447_v26 = vpack.c.bf16 %v276_v23, %v275_v22  ;;  %v278_v27 = vld [vmem:[%s698_s5 + $0x18] sm:$0xff]  ;;  %v279_v29 = vld [vmem:[%s698_s5 + $0x20] sm:$0xff] }
  0x27   :  { %v450_v28 = vpack.c.bf16 %v278_v27, %v277_v24  ;;  %v280_v30 = vld [vmem:[%s698_s5 + $0x28] sm:$0xff]  ;;  %v281_v32 = vld [vmem:[%s698_s5 + $0x30] sm:$0xff]  ;;  %v282_v33 = vld [vmem:[%s698_s5 + $0x38] sm:$0xff] }
  0x28   :  { %448 = vmatpush1.bf16.msra.mxu0 %v447_v26  ;;  %v453_v31 = vpack.c.bf16 %v280_v30, %v279_v29  ;;  %v456_v34 = vpack.c.bf16 %v282_v33, %v281_v32  ;;  %v283_v35 = vld [vmem:[%s698_s5 + $0x40] sm:$0xff]  ;;  %v284_v36 = vld [vmem:[%s698_s5 + $0x48] sm:$0xff]  ;;  %v285_v38 = vld [vmem:[%s698_s5 + $0x50] sm:$0xff] }
  0x29   :  { %417 = vmatpush1.bf16.msra.mxu1 %v416_v45  ;;  %449 = vmatprep.subr.bf16.mxu0 %v515_v25  ;;  %v459_v37 = vpack.c.bf16 %v284_v36, %v283_v35  ;;  %v286_v39 = vld [vmem:[%s698_s5 + $0x58] sm:$0xff]  ;;  %v287_v41 = vld [vmem:[%s698_s5 + $0x60] sm:$0xff]  ;;  %v288_v42 = vld [vmem:[%s698_s5 + $0x68] sm:$0xff] }
  0x2a   :  { %419 = vmatprep.subr.bf16.mxu1 %v418_v46  ;;  %v462_v40 = vpack.c.bf16 %v286_v39, %v285_v38  ;;  %v465_v43 = vpack.c.bf16 %v288_v42, %v287_v41  ;;  %v289_v44 = vld [vmem:[%s698_s5 + $0x70] sm:$0xff]  ;;  %v290_v45 = vld [vmem:[%s698_s5 + $0x78] sm:$0xff]  ;;  %v291_v47 = vld [vmem:[%s698_s5 + $0x80] sm:$0xff] }
  0x2b   :  { %v468_v46 = vpack.c.bf16 %v290_v45, %v289_v44  ;;  %v292_v48 = vld [vmem:[%s698_s5 + $0x88] sm:$0xff]  ;;  %v293_v50 = vld [vmem:[%s698_s5 + $0x90] sm:$0xff]  ;;  %v49_v56 = vld [vmem:[%s695_s2] sm:$0x3] }
  0x2c   :  { %451 = vmatpush1.bf16.msra.mxu0 %v450_v28  ;;  %v471_v49 = vpack.c.bf16 %v292_v48, %v291_v47  ;;  %v295_v2 = vld [vmem:[%s698_s5 + $0xa0] sm:$0xff]  ;;  %v296_v3 = vld [vmem:[%s698_s5 + $0xa8] sm:$0xff] }
  0x2d   :  { %421 = vmatpush1.bf16.msra.mxu1 %v420_v51  ;;  %452 = vmatprep.subr.bf16.mxu0 %v515_v25  ;;  %v294_v51 = vld [vmem:[%s698_s5 + $0x98] sm:$0xff]  ;;  %v477_v4 = vpack.c.bf16 %v296_v3, %v295_v2  ;;  %v186_v8 = vld [vmem:[%s697_s4] sm:$0x3] }
  0x2e   :  { %423 = vmatprep.subr.bf16.mxu1 %v422_v52  ;;  %v474_v52 = vpack.c.bf16 %v294_v51, %v293_v50  ;;  %v191_v9 = vrot.slane %v186_v8, %v53_v55  ;;  %v388_v17 = vld [vmem:[%s699_s6] ss:$0 sm:$0xff] }
  0x30   :  { %454 = vmatpush1.bf16.msra.mxu0 %v453_v31 }
  0x31   :  { %425 = vmatpush1.bf16.msra.mxu1 %v424_v57  ;;  %455 = vmatprep.subr.bf16.mxu0 %v515_v25  ;;  %v57_v57 = vsub.s32 1, %v52_v54 }
  0x32   :  { %427 = vmatprep.subr.bf16.mxu1 %v426_v58  ;;  %v54_v58 = vrot.slane %v49_v56, %v53_v55 }
  0x33   :  { %v58_v59 = vrot.slane %v49_v56, %v57_v57  ;;  %v195_v10 = vrot.slane %v186_v8, %v57_v57 }
  0x34   :  { %457 = vmatpush1.bf16.msra.mxu0 %v456_v34 }
  0x35   :  { %429 = vmatpush1.bf16.msra.mxu1 %v428_v63  ;;  %458 = vmatprep.subr.bf16.mxu0 %v515_v25 }
  0x36   :  { %431 = vmatprep.subr.bf16.mxu1 %v430_v0 }
  0x38   :  { %460 = vmatpush1.bf16.msra.mxu0 %v459_v37 }
  0x39   :  { %433 = vmatpush1.bf16.msra.mxu1 %v432_v5  ;;  %461 = vmatprep.subr.bf16.mxu0 %v515_v25  ;;  %v297_v5 = vld [vmem:[%s698_s5 + $0xb0] sm:$0xff] }
  0x3a   :  { %435 = vmatprep.subr.bf16.mxu1 %v434_v6  ;;  %v298_v6 = vld [vmem:[%s698_s5 + $0xb8] sm:$0xff] }
  0x3b   :  { %v480_v7 = vpack.c.bf16 %v298_v6, %v297_v5 }
  0x3c   :  { %463 = vmatpush1.bf16.msra.mxu0 %v462_v40 }
  0x3d   :  { %437 = vmatpush1.bf16.msra.mxu1 %v436_v11  ;;  %464 = vmatprep.subr.bf16.mxu0 %v515_v25 }
  0x3e   :  { %439 = vmatprep.subr.bf16.mxu1 %v438_v12 }
  0x40   :  { %466 = vmatpush1.bf16.msra.mxu0 %v465_v43 }
  0x41   :  { %441 = vmatpush1.bf16.msra.mxu1 %v440_v15  ;;  %467 = vmatprep.subr.bf16.mxu0 %v515_v25 }
  0x42   :  { %443 = vmatprep.subr.bf16.mxu1 %v442_v18 }
  0x44   :  { %469 = vmatpush1.bf16.msra.mxu0 %v468_v46 }
  0x45   :  { %445 = vmatpush1.bf16.msra.mxu1 %v444_v21  ;;  %470 = vmatprep.subr.bf16.mxu0 %v515_v25 }
  0x48   :  { %472 = vmatpush1.bf16.msra.mxu0 %v471_v49 }
  0x49   :  { %473 = vmatprep.subr.bf16.mxu0 %v515_v25 }
  0x4c   :  { %475 = vmatpush1.bf16.msra.mxu0 %v474_v52 }
  0x4d   :  { %476 = vmatprep.subr.bf16.mxu0 %v515_v25 }
  0x50   :  { %478 = vmatpush1.bf16.msra.mxu0 %v477_v4 }
  0x51   :  { %479 = vmatprep.subr.bf16.mxu0 %v515_v25 }
  0x54   :  { %481 = vmatpush1.bf16.msra.mxu0 %v480_v7 }
  0xf0   :  { %v131_v60 = vpop.f32.mrb[0].mxu0 }
  0xf1   :  { %v132_v61 = vadd.f32 %v131_v60, %v54_v58  ;;  %v133_v62 = vpop.f32.mrb[1].mxu0 }
  0xf2   :  { %v134_v63 = vadd.f32 %v133_v62, %v58_v59 }
  0xf3   :  { %v136_v1 = vmax.f32 %v132_v61, 0.0 }
  0xf4   :  { %v137_v0 = vmax.f32 %v134_v63, 0.0 }
  0xf6   :  { %387 = vmatprep.mubr.msk.f32.mxu1 %vm198_vm1, %v137_v0 }
  0xf7   :  { %267 = vmatmul.mubr.f32.vlgmr.msra.gmra.mrb[0].mxu1 %v136_v1 }
 0x1ca   :  { %v268_v11 = vpop.f32.mrb[0].mxu1 }
 0x1cb   :  { %v269_v12 = vadd.f32 %v268_v11, %v191_v9  ;;  %v270_v13 = vpop.f32.mrb[1].mxu1 }
 0x1cc   :  { %v271_v14 = vadd.f32 %v270_v13, %v195_v10 }
 0x1cd   :  { %v273_v16 = vmax.f32 %v269_v12, 0.0 }
 0x1ce   :  { %v274_v15 = vmax.f32 %v271_v14, 0.0 }
 0x1d0   :  { %389 = vmatprep.mubr.msk.f32.mxu0 %vm198_vm1, %v274_v15 }
 0x1d1   :  { %374 = vmatmul.mubr.f32.vlgmr.msra.gmra.mrb[2].mxu0 %v273_v16 }
 0x2a4   :  { %v375_v18 = vpop.f32.mrb[2].mxu0 }
 0x2a5   :  { %v376_v19 = vadd.f32 %v388_v17, %v375_v18  ;;  %v377_v20 = vpop.f32.mrb[3].mxu0 }
 0x2a7   :  { %380 = vst.msk [vmem:[%s700_s7] sm:$0xff] %vm379_vm2, %v376_v19 }
 0x2a8   :  { %385 = vsyncpa [#allocation3], 1 }

</bundles_post_ra>
